<compile_context>
chip_gen: v7x
topology: tpu7x:2x2x1
jax: 0.10.0
libtpu: 0.0.40
codegen_flags: <defaults>
</compile_context>

<pallas_src>
import functools

import jax
import jax.numpy as jnp
from jax.experimental import pallas as pl
from jax.experimental.pallas import tpu as pltpu


# --------------------------------------------------------------------------- #
# Kernel 1: per-(b, c, t) sum and max over the flattened H*W plane.
# x is viewed as (N, HW) with N = B*C*T; this is the only pass over x (HBM bound).
# --------------------------------------------------------------------------- #
def _spatial_reduce_kernel(x_ref, sum_ref, max_ref):
    x = x_ref[...]                                     # (row_tile, HW)
    sum_ref[...] = jnp.sum(x, axis=1, keepdims=True)   # (row_tile, 1)
    max_ref[...] = jnp.max(x, axis=1, keepdims=True)   # (row_tile, 1)
    # NOTE: the two (row_tile, 1) writebacks are ~HW x smaller than the block read,
    # so merging them into one lane-dense output would not move the HBM roofline;
    # kept separate to avoid extra in-kernel relayouts.


def _pick_row_tile(n_rows, hw):
    """Row tile for kernel 1: a multiple of 8, capped so that
       (a) the double-buffered input block stays <= ~8 MiB (fits v5e's 16 MiB
           scoped-VMEM default; trivially fits v6e/v7x), and
       (b) the grid keeps >= ~8 steps (pipelining + megacore/2-TC sharding)."""
    if n_rows <= 8:
        return n_rows
    vmem_budget = 8 * 1024 * 1024                      # bytes for the 2x input buffers
    by_vmem = vmem_budget // (2 * hw * 4)
    by_grid = max(8, n_rows // 8)
    tile = max(8, min(512, by_vmem, by_grid))
    return (tile // 8) * 8


# --------------------------------------------------------------------------- #
# Kernel 2: both channel gates for the whole batch in one invocation.
# --------------------------------------------------------------------------- #
def _gate_kernel(sum_ref, max_ref, w1_ref, b1_ref, w2_ref, b2_ref,
                 w1t_ref, b1t_ref, w2t_ref, b2t_ref, mc2_ref, *,
                 batch, inv_thw, inv_chw):
    """sum_ref/max_ref: (B, C, T) -- per-(b, c, t) sum / max of x over H*W.
    Gate-1 MLP weights are in y = v @ W form; gate-2 MLP weights arrive already
    transposed to row-major form.  Output: mc2 (B, T)."""
    f32 = jnp.float32

    # ---- ChannelGate1 pools: avg/max over (T,H,W) -> stacked (2B, C) operand ----
    rows1 = []
    for b in range(batch):
        st = sum_ref[b].T                              # (T, C) tiny in-kernel transpose
        rows1.append(jnp.sum(st, axis=0, keepdims=True) * inv_thw)       # (1, C)
    for b in range(batch):
        mt = max_ref[b].T                              # (T, C)
        rows1.append(jnp.max(mt, axis=0, keepdims=True))                 # (1, C)
    pooled1 = jnp.concatenate(rows1, axis=0)           # (2B, C)

    h1 = jnp.maximum(
        jnp.dot(pooled1, w1_ref[...], preferred_element_type=f32) + b1_ref[...], 0.0)
    o1 = jnp.dot(h1, w2_ref[...], preferred_element_type=f32) + b2_ref[...]   # (2B, C)
    scale = jax.nn.sigmoid(o1[:batch] + o1[batch:])    # (B, C)  == mc1 (strictly > 0)

    # ---- ChannelGate2 pools on x*scale permuted to (B,T,C,H,W) -> (2B, T) ----
    rows2 = []
    for b in range(batch):
        srow = scale[b:b + 1, :]                       # (1, C)
        rows2.append(jnp.dot(srow, sum_ref[b],
                             preferred_element_type=f32) * inv_chw)      # (1, T)
    for b in range(batch):
        scol = scale[b:b + 1, :].T                     # (C, 1)
        rows2.append(jnp.max(max_ref[b] * scol, axis=0, keepdims=True))  # (1, T)
    pooled2 = jnp.concatenate(rows2, axis=0)           # (2B, T)

    h2 = jnp.maximum(
        jnp.dot(pooled2, w1t_ref[...], preferred_element_type=f32) + b1t_ref[...], 0.0)
    o2 = jnp.dot(h2, w2t_ref[...], preferred_element_type=f32) + b2t_ref[...]  # (2B, T)
    mc2_ref[...] = jax.nn.sigmoid(o2[:batch] + o2[batch:])                      # (B, T)


# --------------------------------------------------------------------------- #
# Wrapper
# --------------------------------------------------------------------------- #
def mc_forward(x, params):
    """Pallas implementation of MC.forward; returns mc2 of shape (B, T)."""
    w1, b1, w2, b2, w1t, b1t, w2t, b2t = params
    B, C, T, H, W = x.shape
    HW = H * W
    N = B * C * T

    row_tile = _pick_row_tile(N, HW)
    grid1 = pl.cdiv(N, row_tile)                       # cdiv grid: any N handled (tail
                                                       # rows' garbage writes are dropped)

    x2 = x.reshape(N, HW)                              # free row-major reshape
    sums, maxes = pl.pallas_call(
        _spatial_reduce_kernel,
        out_shape=(jax.ShapeDtypeStruct((N, 1), jnp.float32),
                   jax.ShapeDtypeStruct((N, 1), jnp.float32)),
        grid_spec=pltpu.PrefetchScalarGridSpec(
            num_scalar_prefetch=0,
            grid=(grid1,),
            in_specs=[pl.BlockSpec((row_tile, HW), lambda i: (i, 0))],
            out_specs=[pl.BlockSpec((row_tile, 1), lambda i: (i, 0)),
                       pl.BlockSpec((row_tile, 1), lambda i: (i, 0))]),
        compiler_params=pltpu.CompilerParams(dimension_semantics=("parallel",)),
    )(x2)

    # Free reshapes only (split N -> B, C, T); no XLA transpose / extra HBM pass.
    sums_bct = sums.reshape(B, C, T)
    maxes_bct = maxes.reshape(B, C, T)

    # Gate-2 MLP weights in row-major form (transposed once, at trace time).
    w1t_r, b1t_r = w1t.T, b1t.T                        # (T, Ch2), (1, Ch2)
    w2t_r, b2t_r = w2t.T, b2t.T                        # (Ch2, T), (1, T)

    gate_kernel = functools.partial(
        _gate_kernel, batch=B,
        inv_thw=1.0 / float(T * H * W), inv_chw=1.0 / float(C * H * W))

    # Single invocation over the whole batch (no grid): all operands fit VMEM,
    # weights are DMA'd once, MLPs run as stacked row-major matmuls.
    mc2 = pl.pallas_call(
        gate_kernel,
        out_shape=jax.ShapeDtypeStruct((B, T), jnp.float32),
    )(sums_bct, maxes_bct, w1, b1, w2, b2, w1t_r, b1t_r, w2t_r, b2t_r)
    return mc2                                         # (B, T)


# --------------------------------------------------------------------------- #
# Pure-JAX reference of MC.forward (same weight layout as the kernel).
# --------------------------------------------------------------------------- #
def mc_reference(x, params):
    w1, b1, w2, b2, w1t, b1t, w2t, b2t = params

    def mlp1(v):                                       # (B, C)
        h = jnp.maximum(v @ w1 + b1[0], 0.0)
        return h @ w2 + b2[0]

    avg1 = jnp.mean(x, axis=(2, 3, 4))
    max1 = jnp.max(x, axis=(2, 3, 4))
    mc1 = jax.nn.sigmoid(mlp1(avg1) + mlp1(max1))      # (B, C)
    x1 = x * mc1[:, :, None, None, None]
    xt = jnp.transpose(x1, (0, 2, 1, 3, 4))            # (B, T, C, H, W)

    def mlp2(v):                                       # (B, T)
        h = jnp.maximum(v @ w1t.T + b1t[:, 0], 0.0)
        return h @ w2t.T + b2t[:, 0]

    avg2 = jnp.mean(xt, axis=(2, 3, 4))
    max2 = jnp.max(xt, axis=(2, 3, 4))
    return jax.nn.sigmoid(mlp2(avg2) + mlp2(max2))     # (B, T)


if __name__ == "__main__":
    # Small shapes consistent with MC(gate_channels=C, gate_temporal=T).
    B, C, T, H, W = 2, 32, 8, 16, 16
    reduction_ratio = 16                               # ChannelGate1
    Ch1 = C // reduction_ratio                         # hidden of MLP over channels
    Ch2 = T // 2                                       # ChannelGate2 uses reduction 2

    key = jax.random.PRNGKey(0)
    ks = jax.random.split(key, 9)
    # Deterministic synthetic parameters (gate-1 Linear weights stored for y = x @ W;
    # gate-2 weights kept in PyTorch (out, in) layout and transposed in the wrapper).
    w1 = jax.random.normal(ks[0], (C, Ch1), jnp.float32) / jnp.sqrt(C)
    b1 = jax.random.normal(ks[1], (1, Ch1), jnp.float32) * 0.1
    w2 = jax.random.normal(ks[2], (Ch1, C), jnp.float32) / jnp.sqrt(Ch1)
    b2 = jax.random.normal(ks[3], (1, C), jnp.float32) * 0.1
    w1t = jax.random.normal(ks[4], (Ch2, T), jnp.float32) / jnp.sqrt(T)
    b1t = jax.random.normal(ks[5], (Ch2, 1), jnp.float32) * 0.1
    w2t = jax.random.normal(ks[6], (T, Ch2), jnp.float32) / jnp.sqrt(Ch2)
    b2t = jax.random.normal(ks[7], (T, 1), jnp.float32) * 0.1
    params = (w1, b1, w2, b2, w1t, b1t, w2t, b2t)

    x = jax.random.normal(ks[8], (B, C, T, H, W), jnp.float32)

    # TODO(synk): SpatialGate (7x7x7 Conv3d + BatchNorm3d) is dead code in MC.forward
    # (never called), so it is intentionally not implemented.

    mc2 = jax.block_until_ready(mc_forward(x, params))
    ref = jax.block_until_ready(mc_reference(x, params))

    assert mc2.shape == (B, T), mc2.shape
    assert jnp.allclose(mc2, ref, rtol=2e-3, atol=2e-3), (
        f"max abs diff {float(jnp.max(jnp.abs(mc2 - ref)))}")
    print("KERNEL_OK")
</pallas_src>

<mosaic_0001>
module attributes {stable_mosaic.version = 11 : i64} {
  func.func @_spatial_reduce_kernel(%arg0: i32, %arg1: memref<64x256xf32, #tpu.memory_space<vmem>>, %arg2: memref<64x1xf32, #tpu.memory_space<vmem>>, %arg3: memref<64x1xf32, #tpu.memory_space<vmem>>) attributes {dimension_semantics = [#tpu.dimension_semantics<parallel>], iteration_bounds = array<i64: 8>, scalar_prefetch = 0 : i64, scratch_operands = 0 : i64, tpu.core_type = #tpu.core_type<tc>, window_params = [{transform_indices = @transform_0, window_bounds = array<i64: 64, 256>}, {transform_indices = @transform_1, window_bounds = array<i64: 64, 1>}, {transform_indices = @transform_2, window_bounds = array<i64: 64, 1>}]} {
    %c0 = arith.constant 0 : index
    %c0_0 = arith.constant 0 : index
    %0 = vector.load %arg1[%c0, %c0_0] : memref<64x256xf32, #tpu.memory_space<vmem>>, vector<64x256xf32>
    %cst = arith.constant dense<0.000000e+00> : vector<64xf32>
    %1 = vector.multi_reduction <add>, %0, %cst [1] : vector<64x256xf32> to vector<64xf32>
    %2 = vector.shape_cast %1 : vector<64xf32> to vector<64x1xf32>
    %c0_1 = arith.constant 0 : index
    %c0_2 = arith.constant 0 : index
    %3 = vector.load %arg2[%c0_1, %c0_2] : memref<64x1xf32, #tpu.memory_space<vmem>>, vector<64x1xf32>
    tpu.vector_store %arg2[%c0_1, %c0_2], %2 {strides = array<i32>} : memref<64x1xf32, #tpu.memory_space<vmem>>, vector<64x1xf32>,
    %cst_3 = arith.constant dense<0xFF800000> : vector<64xf32>
    %4 = vector.multi_reduction <maximumf>, %0, %cst_3 [1] : vector<64x256xf32> to vector<64xf32>
    %5 = vector.shape_cast %4 : vector<64xf32> to vector<64x1xf32>
    %c0_4 = arith.constant 0 : index
    %c0_5 = arith.constant 0 : index
    %6 = vector.load %arg3[%c0_4, %c0_5] : memref<64x1xf32, #tpu.memory_space<vmem>>, vector<64x1xf32>
    tpu.vector_store %arg3[%c0_4, %c0_5], %5 {strides = array<i32>} : memref<64x1xf32, #tpu.memory_space<vmem>>, vector<64x1xf32>,
    return
  }
  func.func @transform_0(%arg0: i32) -> (i32, i32) {
    %c0_i32 = arith.constant 0 : i32
    %c0_i32_0 = arith.constant 0 : i32
    return %arg0, %c0_i32 : i32, i32
  }
  func.func @transform_1(%arg0: i32) -> (i32, i32) {
    %c0_i32 = arith.constant 0 : i32
    %c0_i32_0 = arith.constant 0 : i32
    return %arg0, %c0_i32 : i32, i32
  }
  func.func @transform_2(%arg0: i32) -> (i32, i32) {
    %c0_i32 = arith.constant 0 : i32
    %c0_i32_0 = arith.constant 0 : i32
    return %arg0, %c0_i32 : i32, i32
  }
}

</mosaic_0001>

<bundles_post_ra>
// kernel: tpu_custom_call.1
= control target key start
LH: loop header
LB: loop body
LE: loop exit
PB: predicated region body
PF: predicated region fallthrough
CT: control target
= control target key end

     0   :  { %8 = vsyncpa [#allocation3], 0  ;;  %s632_s0 = inlined_call_operand.hbm [shape: f32[512,256], index: 0, kind: input, shape index: {}]   ;;  %s633_s1 = inlined_call_operand.vmem [shape: f32[512,1], index: 1, kind: output, shape index: {0}]   ;;  %s634_s2 = inlined_call_operand.vmem [shape: f32[512,1], index: 2, kind: output, shape index: {1}]  }
   0x1   :  { %10 = vsyncpa [#allocation3 + $0x1], 0  ;;  %s506_s9 = smov 0   ;;  %s508_s10 = smov 0  }
   0x2   :  { %s510_s11 = smov 0   ;;  %s512_s12 = smov 0  }
   0x3 LB: > { %s363_s13 = sadd.s32 4294967295, %s486_s12   ;;  %s526_s14 = sadd.s32 1, %s486_s12   ;;  %s486_s12 = sphi %s512_s12, %s641_s12   ;;  %s482_s11 = sphi %s510_s11, %s640_s11   ;;  %s478_s10 = sphi %s508_s10, %s639_s10   ;;  %s474_s9 = sphi %s506_s9, %s638_s9  }
   0x4   : > { %s20_s15 = ssub.s32 %s486_s12, %s526_s14  ;;  %s23_s16 = sadd.s32 1, %s482_s11 }
   0x5   : > { %p21_p0 = scmp.eq.s32.totalorder %s20_s15, 0  ;;  %p30_p1 = scmp.ne.s32.totalorder %s482_s11, %s478_s10 }
   0x6   : > { %p31_p2 = scmp.eq.s32.totalorder %s486_s12, 0  ;;  %p36_p3 = scmp.ne.s32.totalorder %s478_s10, %s474_s9 }
   0x7   : > { %s536_s17 = scalar_select %p21_p0, %s482_s11, %s23_s16  }
   0x8   : > { %p32_p4 = por %p31_p2, %p30_p1  ;;  %p37_p5 = scmp.eq.s32.totalorder %s363_s13, 0 }
   0x9   : > { %p387_p6 = scmp.lt.s32.totalorder %s486_s12, 8  ;;  %s112_s19 = sand.u32 1, %s482_s11  }
   0xa   : > { %p541_p7 = por %p37_p5, %p36_p3  ;;  %s367_s20 = sshll.u32 %s112_s19, 7 }
   0xb   : > { %s380_s21 = sshll.u32 %s486_s12, 11  ;;  %s116_s25 = scalar_lea.vmem [#allocation2], %s367_s20 }
   0xc   : > { %s550_s24 = scalar_lea.hbm %s632_s0, %s380_s21  ;;  %s124_s26 = sshll.u32 %s116_s25, 4  ;;  %s552_s26 = int_to_ptr.vmem [resolvable:$true] %s124_s26 }
   0xd   : > { %p554_p8 = pnand %p387_p6, %p32_p4  ;;  %s559_s28 = scalar_lea.sflag [#allocation3], %s112_s19 }
   0xe   : > { %s422_s29 = scalar_lea.hbm %s550_s24, 2048  ;;  %s427_s4 = scalar_lea.hbm %s632_s0, 16384 }
   0xf   : > { %p423_p10 = scmp.ne.s32.totalorder %s550_s24, %s422_s29  ;;  %p424_p11 = pneg %p554_p8 }
  0x10   : > { %p428_p0 = scmp.lt.u32.totalorder %s550_s24, %s632_s0  ;;  %p429_p1 = scmp.lt.u32.totalorder %s427_s4, %s422_s29 }
  0x11   : > { %p425_p12 = pnand %p424_p11, %p423_p10  ;;  %p431_p3 = scmp.lt.u32.totalorder %s422_s29, %s550_s24 }
  0x12   : > { %p430_p2 = por %p429_p1, %p428_p0 }
  0x13   : > { %p426_p13 = pneg %p425_p12 }
  0x14   : > { %p432_p4 = por %p431_p3, %p430_p2 }
  0x16   : > { %p433_p5 = pnand %p432_p4, %p426_p13 }
  0x18   : > { %436 = shalt.err (!%p433_p5)
}
  0x19   : > { %s437_s7 = scalar_lea.vmem %s552_s26, 2048  ;;  %s488_s8 = smov [#allocation2]  }
  0x1a   : > { %p438_p6 = scmp.ne.s32.totalorder %s552_s26, %s437_s7  ;;  %s442_s9 = sshll.u32 %s488_s8, 4  ;;  %s443_s9 = int_to_ptr.vmem [resolvable:$false] %s442_s9 }
  0x1b   : > { %s444_s15 = scalar_lea.vmem %s443_s9, 4096  ;;  %p445_p9 = scmp.lt.s32.totalorder %s552_s26, %s443_s9 }
  0x1c   : > { %p440_p10 = pnand %p438_p6, %p424_p11  ;;  %p446_p0 = scmp.lt.s32.totalorder %s444_s15, %s437_s7 }
  0x1e   : > { %p441_p12 = pneg %p440_p10  ;;  %p447_p1 = por %p446_p0, %p445_p9 }
  0x20   : > { %p448_p2 = pnand %p447_p1, %p441_p12 }
  0x22   : > { %451 = shalt.err (!%p448_p2)
}
  0x23   : > { %s489_s16 = smov 256   ;;  %s490_s19 = smov 16  }
  0x24   : > { %386 = dma.hbm_to_vmem [thread:$0]  (!%p554_p8), %s550_s24, 2048, %s552_s26, %s559_s28, %s489_s16, %s489_s16, %s490_s19  }
  0x25   : > { %p132_p11 = scmp.lt.s32.totalorder %s486_s12, 9  ;;  %p637_p13 = scmp.ge.s32.totalorder %s486_s12, 1 }
  0x27   : > { %p133_p3 = pnand %p637_p13, %p132_p11 }
  0x28   : > { %s138_s20 = sand.u32 (!%p133_p3), 1, %s478_s10  }
  0x29   : > { %136 = sbr.rel (%p133_p3) target bundleno = 224 (0xe0), region = 24  ;;  %s372_s21 = sshll.u32 (!%p133_p3), %s138_s20, 7 }
  0x2a   : > { %s139_s22 = scalar_lea.sflag (!%p133_p3), [#allocation3], %s138_s20  ;;  %s142_s23 = scalar_lea.vmem (!%p133_p3), [#allocation2], %s372_s21 }
  0x30   : > { %469 = dma.done.wait (%p541_p7), %s139_s22, 2048  }
  0x31   : > { %471 = vsyncadd (%p541_p7), %s139_s22, 4294965248  ;;  %v185_v0 = vld [vmem:[%s142_s23 + $0x20] sm:$0xff]  ;;  %v186_v1 = vld [vmem:[%s142_s23 + $0x28] sm:$0xff]  ;;  %s373_s18 = sshll.u32 %s363_s13, 3  ;;  %vm221_vm0 = vcmask 7168  }
  0x32   : > { %v181_v2 = vld [vmem:[%s142_s23] sm:$0xff]  ;;  %v203_v3 = vadd.f32 %v186_v1, %v185_v0  ;;  %v182_v4 = vld [vmem:[%s142_s23 + $0x8] sm:$0xff]  ;;  %v187_v5 = vld [vmem:[%s142_s23 + $0x30] sm:$0xff]  ;;  %v236_v27 = vmax.f32 %v185_v0, %v186_v1  ;;  %p170_p7 = scmp.lt.s32.totalorder %s373_s18, 63 }
  0x33   : > { %v188_v6 = vld [vmem:[%s142_s23 + $0x38] sm:$0xff]  ;;  %v197_v7 = vadd.f32 %v182_v4, %v181_v2  ;;  %v183_v8 = vld [vmem:[%s142_s23 + $0x10] sm:$0xff]  ;;  %v189_v14 = vld [vmem:[%s142_s23 + $0x40] sm:$0xff]  ;;  %v230_v25 = vmax.f32 %v181_v2, %v182_v4 }
  0x34   : > { %v184_v9 = vld [vmem:[%s142_s23 + $0x18] sm:$0xff]  ;;  %204 = vadd.xlane.f32.xlu1 %v203_v3  ;;  %v206_v10 = vadd.f32 %v188_v6, %v187_v5  ;;  %v191_v12 = vld [vmem:[%s142_s23 + $0x50] sm:$0xff]  ;;  %v190_v15 = vld [vmem:[%s142_s23 + $0x48] sm:$0xff]  ;;  %v239_v26 = vmax.f32 %v187_v5, %v188_v6  ;;  %s643_s18 = smov (!%p170_p7, %s373_s18), 63 }
  0x35   : > { %198 = vadd.xlane.f32.xlu0 %v197_v7  ;;  %v200_v11 = vadd.f32 %v184_v9, %v183_v8  ;;  %v192_v13 = vld [vmem:[%s142_s23 + $0x58] sm:$0xff]  ;;  %v209_v17 = vadd.f32 %v190_v15, %v189_v14  ;;  %v195_v18 = vld [vmem:[%s142_s23 + $0x70] sm:$0xff]  ;;  %v193_v20 = vld [vmem:[%s142_s23 + $0x60] sm:$0xff]  ;;  %v233_v24 = vmax.f32 %v183_v8, %v184_v9  ;;  %v242_v29 = vmax.f32 %v189_v14, %v190_v15  ;;  %s374_s24 = sshll.u32 %s643_s18, 3 }
  0x36   : > { %v212_v16 = vadd.f32 %v192_v13, %v191_v12  ;;  %v196_v19 = vld [vmem:[%s142_s23 + $0x78] sm:$0xff]  ;;  %v194_v21 = vld [vmem:[%s142_s23 + $0x68] sm:$0xff]  ;;  %v245_v28 = vmax.f32 %v191_v12, %v192_v13  ;;  %s173_s27 = scalar_lea.vmem %s633_s1, %s374_s24  ;;  %s179_s28 = scalar_lea.vmem %s634_s2, %s374_s24 }
  0x37   : > { %v218_v22 = vadd.f32 %v196_v19, %v195_v18  ;;  %v215_v23 = vadd.f32 %v194_v21, %v193_v20  ;;  %v251_v30 = vmax.f32 %v195_v18, %v196_v19  ;;  %v248_v31 = vmax.f32 %v193_v20, %v194_v21 }
  0x38   : > { %207 = vadd.xlane.f32.xlu1 %v206_v10 }
  0x39   : > { %201 = vadd.xlane.f32.xlu0 %v200_v11 }
  0x3c   : > { %213 = vadd.xlane.f32.xlu1 %v212_v16 }
  0x3d   : > { %210 = vadd.xlane.f32.xlu0 %v209_v17 }
  0x40   : > { %219 = vadd.xlane.f32.xlu1 %v218_v22 }
  0x41   : > { %216 = vadd.xlane.f32.xlu0 %v215_v23 }
  0x44   : > { %234 = vmax.xlane.f32.xlu1 %v233_v24 }
  0x45   : > { %231 = vmax.xlane.f32.xlu0 %v230_v25 }
  0x48   : > { %240 = vmax.xlane.f32.xlu1 %v239_v26 }
  0x49   : > { %237 = vmax.xlane.f32.xlu0 %v236_v27 }
  0x4c   : > { %246 = vmax.xlane.f32.xlu1 %v245_v28 }
  0x4d   : > { %243 = vmax.xlane.f32.xlu0 %v242_v29 }
  0x50   : > { %252 = vmax.xlane.f32.xlu1 %v251_v30 }
  0x51   : > { %249 = vmax.xlane.f32.xlu0 %v248_v31 }
  0xc1   : > { %v205_v32 = vpop.xlane.xlu1 %204 }
  0xc2   : > { %224 = vst.msk [vmem:[%s173_s27 + $0x10] sm:$0xff] %vm221_vm0, %v205_v32  ;;  %v199_v33 = vpop.xlane.xlu0 %198 }
  0xc3   : > { %222 = vst.msk [vmem:[%s173_s27] sm:$0xff] %vm221_vm0, %v199_v33 }
  0xc5   : > { %v208_v34 = vpop.xlane.xlu1 %207 }
  0xc6   : > { %225 = vst.msk [vmem:[%s173_s27 + $0x18] sm:$0xff] %vm221_vm0, %v208_v34  ;;  %v202_v35 = vpop.xlane.xlu0 %201 }
  0xc7   : > { %223 = vst.msk [vmem:[%s173_s27 + $0x8] sm:$0xff] %vm221_vm0, %v202_v35 }
  0xc9   : > { %v214_v36 = vpop.xlane.xlu1 %213 }
  0xca   : > { %227 = vst.msk [vmem:[%s173_s27 + $0x28] sm:$0xff] %vm221_vm0, %v214_v36  ;;  %v211_v37 = vpop.xlane.xlu0 %210 }
  0xcb   : > { %226 = vst.msk [vmem:[%s173_s27 + $0x20] sm:$0xff] %vm221_vm0, %v211_v37 }
  0xcd   : > { %v220_v38 = vpop.xlane.xlu1 %219 }
  0xce   : > { %229 = vst.msk [vmem:[%s173_s27 + $0x38] sm:$0xff] %vm221_vm0, %v220_v38  ;;  %v217_v39 = vpop.xlane.xlu0 %216 }
  0xcf   : > { %228 = vst.msk [vmem:[%s173_s27 + $0x30] sm:$0xff] %vm221_vm0, %v217_v39 }
  0xd1   : > { %v235_v40 = vpop.xlane.xlu1 %234 }
  0xd2   : > { %255 = vst.msk [vmem:[%s179_s28 + $0x8] sm:$0xff] %vm221_vm0, %v235_v40  ;;  %v232_v41 = vpop.xlane.xlu0 %231 }
  0xd3   : > { %254 = vst.msk [vmem:[%s179_s28] sm:$0xff] %vm221_vm0, %v232_v41 }
  0xd5   : > { %v241_v42 = vpop.xlane.xlu1 %240 }
  0xd6   : > { %257 = vst.msk [vmem:[%s179_s28 + $0x18] sm:$0xff] %vm221_vm0, %v241_v42  ;;  %v238_v43 = vpop.xlane.xlu0 %237 }
  0xd7   : > { %256 = vst.msk [vmem:[%s179_s28 + $0x10] sm:$0xff] %vm221_vm0, %v238_v43 }
  0xd9   : > { %v247_v44 = vpop.xlane.xlu1 %246 }
  0xda   : > { %259 = vst.msk [vmem:[%s179_s28 + $0x28] sm:$0xff] %vm221_vm0, %v247_v44  ;;  %v244_v45 = vpop.xlane.xlu0 %243 }
  0xdb   : > { %258 = vst.msk [vmem:[%s179_s28 + $0x20] sm:$0xff] %vm221_vm0, %v244_v45 }
  0xdd   : > { %v253_v46 = vpop.xlane.xlu1 %252 }
  0xde   : > { %261 = vst.msk [vmem:[%s179_s28 + $0x38] sm:$0xff] %vm221_vm0, %v253_v46  ;;  %v250_v47 = vpop.xlane.xlu0 %249 }
  0xdf   : > { %260 = vst.msk [vmem:[%s179_s28 + $0x30] sm:$0xff] %vm221_vm0, %v250_v47 }
  0xe0 PF: > { %p13_p8 = scmp.ge.s32.totalorder %s526_s14, 10   ;;  %s638_s9 = smov %s478_s10 }
  0xe1   : > { %s639_s10 = smov %s482_s11  ;;  %s640_s11 = smov %s536_s17 }
  0xe2   : > { %s641_s12 = smov %s526_s14  ;;  %15 = sbr.rel (!%p13_p8) target bundleno = 3 (0x3), region = 76 }
  0xe9   :  { %301 = vsyncpa [#allocation3], 1 }
  0xea   :  { %303 = vsyncpa [#allocation3 + $0x1], 1 }

</bundles_post_ra>
